<compile_context>
chip_gen: v7x
topology: tpu7x:2x2x1
jax: 0.10.0
libtpu: 0.0.40
codegen_flags: <defaults>
</compile_context>

<pallas_src>
import jax
import jax.numpy as jnp
from jax.experimental import pallas as pl
from jax.experimental.pallas import tpu as pltpu


# ------------------------------ Pallas kernel ------------------------------

def _matmul_bn_kernel(lhs_ref, w_ref, scale_ref, bias_ref, o_ref):
    # lhs_ref:   (1, TM, K)      im2col patches (one batch elem, one row tile)
    # w_ref:     (K, TCout)      conv weights, K = Cin*KH*KW, Cout zero-padded
    # scale_ref: (1, TCout)      f32 BN scale  (gamma / sqrt(var + eps))
    # bias_ref:  (1, TCout)      f32 shift     ((conv_bias - mean)*scale + beta)
    # o_ref:     (1, TM, TCout)  lane-dense output tile
    acc = jnp.dot(lhs_ref[0], w_ref[...], preferred_element_type=jnp.float32)
    o_ref[0] = (acc * scale_ref[...] + bias_ref[...]).astype(o_ref.dtype)


# ------------------------------ module wrapper ------------------------------

def _round_up(x, m):
    return (x + m - 1) // m * m


def conv2d_batchnorm(x_nchw, params, *, stride, padding, dilation,
                     use_bf16=False):
    """Conv2d(stride, padding, dilation, groups=1) + eval-mode BatchNorm2d."""
    w, conv_bias, gamma, beta, rmean, rvar, eps = params
    N, Cin, H, W = x_nchw.shape
    Cout, _, KH, KW = w.shape
    s, p, d = int(stride), int(padding), int(dilation)

    Hp, Wp = H + 2 * p, W + 2 * p
    Hout = (Hp - d * (KH - 1) - 1) // s + 1
    Wout = (Wp - d * (KW - 1) - 1) // s + 1
    M = Hout * Wout
    K = Cin * KH * KW

    cdt = jnp.bfloat16 if use_bf16 else jnp.float32

    # ---- im2col, one wrapper pass: (N, M, K) with K ordered (kh, kw, cin) ----
    # Only the exact taps used by the conv are gathered (no unused stride
    # phases), and every in-kernel access becomes a dense unit-stride tile.
    x_nhwc = jnp.transpose(x_nchw, (0, 2, 3, 1))
    x_pad = jnp.pad(x_nhwc, ((0, 0), (p, p), (p, p), (0, 0)))
    taps = []
    for kh in range(KH):
        for kw in range(KW):
            r0, c0 = kh * d, kw * d
            taps.append(x_pad[:, r0:r0 + (Hout - 1) * s + 1:s,
                                 c0:c0 + (Wout - 1) * s + 1:s, :])
    lhs = jnp.concatenate(taps, axis=-1).reshape(N, M, K).astype(cdt)

    # ---- tile sizes: lane-dense Cout (multiple of 128), <=128 rows / step ----
    TCout = 128
    Cout_pad = _round_up(Cout, TCout)
    TM = 128 if M >= 128 else _round_up(M, 8)
    M_pad = _round_up(M, TM)
    if M_pad != M:
        lhs = jnp.pad(lhs, ((0, 0), (0, M_pad - M), (0, 0)))

    # ---- weights (K, Cout_pad); BN scale/shift stay f32 for the epilogue ----
    w_rs = jnp.transpose(w, (2, 3, 1, 0)).reshape(K, Cout)          # (kh,kw,cin) major->minor
    w_rs = jnp.pad(w_rs, ((0, 0), (0, Cout_pad - Cout))).astype(cdt)
    scale = gamma / jnp.sqrt(rvar + eps)                             # (Cout,)
    cb = conv_bias if conv_bias is not None else jnp.zeros((Cout,), jnp.float32)
    shift = (cb - rmean) * scale + beta
    scale_p = jnp.pad(scale, (0, Cout_pad - Cout)).reshape(1, Cout_pad).astype(jnp.float32)
    shift_p = jnp.pad(shift, (0, Cout_pad - Cout)).reshape(1, Cout_pad).astype(jnp.float32)

    grid = (N, M_pad // TM, Cout_pad // TCout)

    in_bytes = 2 if use_bf16 else 4
    block_bytes = (2 * TM * K * in_bytes          # lhs, double-buffered
                   + 2 * TM * TCout * 4           # out, double-buffered (f32)
                   + 2 * K * TCout * in_bytes     # weights, double-buffered
                   + 4 * TCout * 4)               # scale + shift
    # Sized conservatively for v7x (64 MiB physical VMEM); plenty on v5e/v6e.
    vmem_limit = int(min(48 * 1024 * 1024, max(32 * 1024 * 1024, 2 * block_bytes)))

    cost = pl.CostEstimate(
        flops=2 * N * M_pad * K * Cout_pad,
        transcendentals=0,
        bytes_accessed=(lhs.size * in_bytes + w_rs.size * in_bytes
                        + (scale_p.size + shift_p.size) * 4
                        + N * M_pad * Cout_pad * 4))

    out = pl.pallas_call(
        _matmul_bn_kernel,
        out_shape=jax.ShapeDtypeStruct((N, M_pad, Cout_pad), jnp.float32),
        grid=grid,
        in_specs=[
            pl.BlockSpec((1, TM, K), lambda n, m, c: (n, m, 0)),
            pl.BlockSpec((K, TCout), lambda n, m, c: (0, c)),
            pl.BlockSpec((1, TCout), lambda n, m, c: (0, c)),
            pl.BlockSpec((1, TCout), lambda n, m, c: (0, c)),
        ],
        out_specs=pl.BlockSpec((1, TM, TCout), lambda n, m, c: (n, m, c)),
        compiler_params=pltpu.CompilerParams(
            dimension_semantics=("parallel", "parallel", "parallel"),
            vmem_limit_bytes=vmem_limit),
        cost_estimate=cost,
    )(lhs, w_rs, scale_p, shift_p)

    # drop lane/row padding, single transpose back to the PyTorch NCHW layout
    out = out[:, :M, :Cout].reshape(N, Hout, Wout, Cout)
    return jnp.transpose(out, (0, 3, 1, 2))


# ------------------------------ reference + test -----------------------------

def conv2d_batchnorm_ref(x, params, *, stride, padding, dilation):
    """Pure-JAX reference (same math, no Pallas)."""
    w, conv_bias, gamma, beta, rmean, rvar, eps = params
    y = jax.lax.conv_general_dilated(
        x, w, window_strides=(stride, stride),
        padding=[(padding, padding), (padding, padding)],
        rhs_dilation=(dilation, dilation),
        dimension_numbers=("NCHW", "OIHW", "NCHW"))
    if conv_bias is not None:
        y = y + conv_bias[None, :, None, None]
    scale = gamma / jnp.sqrt(rvar + eps)
    return ((y - rmean[None, :, None, None]) * scale[None, :, None, None]
            + beta[None, :, None, None])


def init_params(key, in_channels, out_channels, kernel_size, bias, eps=1e-5):
    k1, k2, k3, k4, k5, k6 = jax.random.split(key, 6)
    fan_in = in_channels * kernel_size * kernel_size
    w = jax.random.normal(
        k1, (out_channels, in_channels, kernel_size, kernel_size),
        jnp.float32) / (float(fan_in) ** 0.5)
    cb = (0.1 * jax.random.normal(k2, (out_channels,), jnp.float32)
          if bias else None)
    gamma = 1.0 + 0.1 * jax.random.normal(k3, (out_channels,), jnp.float32)
    beta = 0.1 * jax.random.normal(k4, (out_channels,), jnp.float32)
    rmean = 0.1 * jax.random.normal(k5, (out_channels,), jnp.float32)
    rvar = jnp.abs(jax.random.normal(k6, (out_channels,), jnp.float32)) + 0.5
    return (w, cb, gamma, beta, rmean, rvar, eps)


if __name__ == "__main__":
    key = jax.random.PRNGKey(0)
    kx, kp1, kp2 = jax.random.split(key, 3)

    N, Cin, Cout, H, W = 2, 8, 32, 16, 16
    x = jax.random.normal(kx, (N, Cin, H, W), dtype=jnp.float32)

    # Config A: 3x3, stride 1, pad 1, dilation 1, bias=True
    pA = init_params(kp1, Cin, Cout, 3, bias=True)
    outA = jax.block_until_ready(
        conv2d_batchnorm(x, pA, stride=1, padding=1, dilation=1))
    refA = conv2d_batchnorm_ref(x, pA, stride=1, padding=1, dilation=1)
    assert outA.shape == (N, Cout, H, W), outA.shape
    assert jnp.allclose(outA, refA, atol=1e-4, rtol=1e-4), "config A mismatch"

    # Config B: 3x3, stride 2, pad 2, dilation 2, bias=False
    pB = init_params(kp2, Cin, Cout, 3, bias=False)
    outB = jax.block_until_ready(
        conv2d_batchnorm(x, pB, stride=2, padding=2, dilation=2))
    refB = conv2d_batchnorm_ref(x, pB, stride=2, padding=2, dilation=2)
    assert outB.shape == refB.shape, (outB.shape, refB.shape)
    assert jnp.allclose(outB, refB, atol=1e-4, rtol=1e-4), "config B mismatch"

    # Config A with bf16 MXU operands (v6e/v7x path), f32 accumulation + f32
    # BN scale/shift epilogue.
    outAb = jax.block_until_ready(
        conv2d_batchnorm(x, pA, stride=1, padding=1, dilation=1, use_bf16=True))
    assert jnp.allclose(outAb, refA, atol=1e-1, rtol=1e-1), "bf16 path mismatch"

    print("KERNEL_OK")
</pallas_src>

<mosaic_0001>
module attributes {stable_mosaic.version = 11 : i64} {
  func.func @_matmul_bn_kernel(%arg0: i32, %arg1: i32, %arg2: i32, %arg3: memref<1x128x72xf32, #tpu.memory_space<vmem>>, %arg4: memref<72x128xf32, #tpu.memory_space<vmem>>, %arg5: memref<1x128xf32, #tpu.memory_space<vmem>>, %arg6: memref<1x128xf32, #tpu.memory_space<vmem>>, %arg7: memref<1x128x128xf32, #tpu.memory_space<vmem>>) attributes {dimension_semantics = [#tpu.dimension_semantics<parallel>, #tpu.dimension_semantics<parallel>, #tpu.dimension_semantics<parallel>], iteration_bounds = array<i64: 2, 2, 1>, scalar_prefetch = 0 : i64, scratch_operands = 0 : i64, tpu.core_type = #tpu.core_type<tc>, window_params = [{transform_indices = @transform_0, window_bounds = array<i64: 1, 128, 72>}, {transform_indices = @transform_1, window_bounds = array<i64: 72, 128>}, {transform_indices = @transform_2, window_bounds = array<i64: 1, 128>}, {transform_indices = @transform_3, window_bounds = array<i64: 1, 128>}, {transform_indices = @transform_4, window_bounds = array<i64: 1, 128, 128>}]} {
    %c0 = arith.constant 0 : index
    %c0_0 = arith.constant 0 : index
    %c0_1 = arith.constant 0 : index
    %0 = vector.load %arg3[%c0, %c0_0, %c0_1] : memref<1x128x72xf32, #tpu.memory_space<vmem>>, vector<1x128x72xf32>
    %1 = vector.shape_cast %0 : vector<1x128x72xf32> to vector<128x72xf32>
    %c0_2 = arith.constant 0 : index
    %c0_3 = arith.constant 0 : index
    %2 = vector.load %arg4[%c0_2, %c0_3] : memref<72x128xf32, #tpu.memory_space<vmem>>, vector<72x128xf32>
    %cst = arith.constant dense<0.000000e+00> : vector<128x128xf32>
    %3 = tpu.matmul %1, %2, %cst {dimension_numbers = #tpu.dot_dimension_numbers<[1], [0], [0], [1], [0, 0, 1, 1], [], []>} : vector<128x72xf32>, vector<72x128xf32>, vector<128x128xf32> -> vector<128x128xf32>
    %c0_4 = arith.constant 0 : index
    %c0_5 = arith.constant 0 : index
    %4 = vector.load %arg5[%c0_4, %c0_5] : memref<1x128xf32, #tpu.memory_space<vmem>>, vector<1x128xf32>
    %5 = vector.broadcast %4 : vector<1x128xf32> to vector<128x128xf32>
    %6 = arith.mulf %3, %5 : vector<128x128xf32>
    %c0_6 = arith.constant 0 : index
    %c0_7 = arith.constant 0 : index
    %7 = vector.load %arg6[%c0_6, %c0_7] : memref<1x128xf32, #tpu.memory_space<vmem>>, vector<1x128xf32>
    %8 = vector.broadcast %7 : vector<1x128xf32> to vector<128x128xf32>
    %9 = arith.addf %6, %8 : vector<128x128xf32>
    %c0_8 = arith.constant 0 : index
    %c0_9 = arith.constant 0 : index
    %c0_10 = arith.constant 0 : index
    %10 = vector.load %arg7[%c0_8, %c0_9, %c0_10] : memref<1x128x128xf32, #tpu.memory_space<vmem>>, vector<1x128x128xf32>
    %11 = vector.shape_cast %10 : vector<1x128x128xf32> to vector<128x128xf32>
    %12 = vector.shape_cast %9 : vector<128x128xf32> to vector<1x128x128xf32>
    tpu.vector_store %arg7[%c0_8, %c0_9, %c0_10], %12 {strides = array<i32>} : memref<1x128x128xf32, #tpu.memory_space<vmem>>, vector<1x128x128xf32>,
    return
  }
  func.func @transform_0(%arg0: i32, %arg1: i32, %arg2: i32) -> (i32, i32, i32) {
    %c0_i32 = arith.constant 0 : i32
    %c0_i32_0 = arith.constant 0 : i32
    return %arg0, %arg1, %c0_i32 : i32, i32, i32
  }
  func.func @transform_1(%arg0: i32, %arg1: i32, %arg2: i32) -> (i32, i32) {
    %c0_i32 = arith.constant 0 : i32
    %c0_i32_0 = arith.constant 0 : i32
    return %c0_i32, %arg2 : i32, i32
  }
  func.func @transform_2(%arg0: i32, %arg1: i32, %arg2: i32) -> (i32, i32) {
    %c0_i32 = arith.constant 0 : i32
    %c0_i32_0 = arith.constant 0 : i32
    return %c0_i32, %arg2 : i32, i32
  }
  func.func @transform_3(%arg0: i32, %arg1: i32, %arg2: i32) -> (i32, i32) {
    %c0_i32 = arith.constant 0 : i32
    %c0_i32_0 = arith.constant 0 : i32
    return %c0_i32, %arg2 : i32, i32
  }
  func.func @transform_4(%arg0: i32, %arg1: i32, %arg2: i32) -> (i32, i32, i32) {
    %c0_i32 = arith.constant 0 : i32
    return %arg0, %arg1, %arg2 : i32, i32, i32
  }
}

</mosaic_0001>

<bundles_post_ra>
// kernel: tpu_custom_call.1
= control target key start
LH: loop header
LB: loop body
LE: loop exit
PB: predicated region body
PF: predicated region fallthrough
CT: control target
= control target key end

     0   :  { %9 = vsyncpa [#allocation3], 0  ;;  %s1302_s0 = inlined_call_operand.vmem [shape: f32[2,256,72], index: 0, kind: input, shape index: {}]   ;;  %s1303_s1 = inlined_call_operand.vmem [shape: f32[72,128], index: 1, kind: input, shape index: {}]   ;;  %s1304_s2 = inlined_call_operand.vmem [shape: f32[1,128], index: 2, kind: input, shape index: {}]   ;;  %s1305_s3 = inlined_call_operand.vmem [shape: f32[1,128], index: 3, kind: input, shape index: {}]   ;;  %s1306_s4 = inlined_call_operand.hbm [shape: f32[2,256,128], index: 4, kind: output, shape index: {}]  }
   0x1   :  { %11 = vsyncpa [#allocation3 + $0x1], 0  ;;  %s1030_s15 = smov 0   ;;  %s1032_s16 = smov 0  }
   0x2   :  { %s1034_s17 = smov 0   ;;  %s1036_s18 = smov 0  }
   0x3   :  { %s1038_s19 = smov 0   ;;  %s1040_s20 = smov 0  }
   0x4   :  { %s1042_s21 = smov 0   ;;  %s1044_s22 = smov 0  }
   0x5 LB: > { %s704_s23 = sadd.s32 4294967295, %s1000_s22   ;;  %s705_s24 = sadd.s32 4294967294, %s1000_s22   ;;  %s1000_s22 = sphi %s1044_s22, %s17_s22   ;;  %s996_s21 = sphi %s1042_s21, %s1315_s21   ;;  %s992_s20 = sphi %s1040_s20, %s1314_s20   ;;  %s988_s19 = sphi %s1038_s19, %s1313_s19   ;;  %s984_s18 = sphi %s1036_s18, %s1312_s18   ;;  %s980_s17 = sphi %s1034_s17, %s1311_s17   ;;  %s976_s16 = sphi %s1032_s16, %s1310_s16   ;;  %s972_s15 = sphi %s1030_s15, %s1309_s15  }
   0x6   : > { %s32_s25 = sadd.s32 1, %s992_s20  ;;  %s36_s26 = sadd.s32 1, %s996_s21 }
   0x7   : > { %p34_p0 = scmp.ge.s32.totalorder %s32_s25, 2  ;;  %p163_p1 = scmp.ne.s32.totalorder %s980_s17, %s976_s16 }
   0x8   : > { %p164_p2 = scmp.eq.s32.totalorder %s704_s23, 3  ;;  %p169_p5 = scmp.ne.s32.totalorder %s976_s16, %s972_s15 }
   0x9   : > { %s1317_s25 = smov (%p34_p0, %s32_s25), 0  ;;  %s1319_s26 = smov (!%p34_p0, %s36_s26), %s996_s21 }
   0xa   : > { %s147_s27 = ssub.s32 %s992_s20, %s1317_s25  ;;  %p1081_p3 = por %p164_p2, %p163_p1 }
   0xb   : > { %p38_p4 = scmp.ge.s32.totalorder %s1319_s26, 2  ;;  %p170_p6 = scmp.eq.s32.totalorder %s705_s24, 3 }
   0xc   : > { %p711_p7 = scmp.ge.s32.totalorder %s1000_s22, 1  ;;  %p220_p9 = scmp.lt.s32.totalorder %s1000_s22, 5 }
   0xd   : > { %s1321_s26 = smov (%p38_p4, %s1319_s26), 0  ;;  %p1090_p8 = por %p170_p6, %p169_p5 }
   0xe   : > { %s146_s30 = ssub.s32 %s996_s21, %s1321_s26  ;;  %s153_s5 = sadd.s32 1, %s980_s17 }
   0xf   : > { %s148_s6 = sor.u32 %s147_s27, %s146_s30  ;;  %p221_p10 = pnand %p711_p7, %p220_p9 }
  0x10   : > { %p151_p11 = scmp.eq.s32.totalorder %s148_s6, 0  ;;  %v297_v0 = vld [vmem:[%s1303_s1] sm:$0xff] (!%p221_p10)  ;;  %v298_v1 = vld [vmem:[%s1303_s1 + $0x8] sm:$0xff] (!%p221_p10)  ;;  %v299_v2 = vld [vmem:[%s1303_s1 + $0x10] sm:$0xff] (!%p221_p10)  ;;  %s1111_s14 = sshll.u32 (!%p221_p10), %s984_s18, 4  ;;  %vm306_vm0 = vcmask (!%p221_p10), 588800  }
  0x11   : > { %224 = sbr.rel (%p221_p10) target bundleno = 282 (0x11a), region = 36  ;;  %p261_p12 = scmp.lt.s32.totalorder (!%p221_p10), %s988_s19, 1  ;;  %v807_v3 = vpack.c.bf16 (!%p221_p10), %v298_v1, %v297_v0  ;;  %v300_v4 = vld [vmem:[%s1303_s1 + $0x18] sm:$0xff] (!%p221_p10)  ;;  %v301_v6 = vld [vmem:[%s1303_s1 + $0x20] sm:$0xff] (!%p221_p10)  ;;  %v302_v7 = vld [vmem:[%s1303_s1 + $0x28] sm:$0xff] (!%p221_p10) }
  0x12   : > { %s1099_s7 = scalar_select %p151_p11, %s980_s17, %s153_s5  }
  0x13   : > { %p263_p13 = scmp.lt.s32.totalorder (!%p221_p10), %s1111_s14, 31  ;;  %v811_v5 = vpack.c.bf16 (!%p221_p10), %v300_v4, %v299_v2  ;;  %808 = vmatprep.subr.bf16.mxu0 (!%p221_p10), %v807_v3  ;;  %823 = vmatprep.subr.bf16.mxu1 (!%p221_p10), %v807_v3  ;;  %v815_v8 = vpack.c.bf16 (!%p221_p10), %v302_v7, %v301_v6  ;;  %v303_v9 = vld [vmem:[%s1303_s1 + $0x30] sm:$0xff] (!%p221_p10)  ;;  %v304_v10 = vld [vmem:[%s1303_s1 + $0x38] sm:$0xff] (!%p221_p10)  ;;  %v305_v14 = vld [vmem:[%s1303_s1 + $0x40] sm:$0xff] (!%p221_p10)  ;;  %s736_s23 = sshll.u32 (!%p221_p10), %s988_s19, 5 }
  0x14   : > { %810 = vmatpush3.bf16.msra.mxu0 (!%p221_p10), %v807_v3  ;;  %828 = vmatpush3.bf16.msra.mxu1 (!%p221_p10), %v807_v3  ;;  %v819_v13 = vpack.c.bf16 (!%p221_p10), %v304_v10, %v303_v9  ;;  %v1176_v29 = vld [vmem:[%s1304_s2] ss:$0 sm:$0xff] (!%p221_p10) }
  0x15   : > { %812 = vmatprep.subr.bf16.mxu0 (!%p221_p10), %v811_v5  ;;  %824 = vmatprep.subr.bf16.mxu1 (!%p221_p10), %v811_v5  ;;  %v1183_v31 = vld [vmem:[%s1305_s3] ss:$0 sm:$0xff] (!%p221_p10) }
  0x18   : > { %s262_s18 = scalar_select %p261_p12, %s988_s19, 1  ;;  %814 = vmatpush3.bf16.msra.mxu0 %v811_v5  ;;  %829 = vmatpush3.bf16.msra.mxu1 %v811_v5 }
  0x19   : > { %s264_s8 = scalar_select %p263_p13, %s1111_s14, 31  ;;  %816 = vmatprep.subr.bf16.mxu0 %v815_v8  ;;  %825 = vmatprep.subr.bf16.mxu1 %v815_v8 }
  0x1a   : > { %s714_s9 = sshll.u32 %s262_s18, 5  ;;  %s1207_s19 = sadd.s32 %s736_s23, %s1111_s14 }
  0x1b   : > { %s266_s10 = sadd.s32 %s714_s9, %s264_s8  ;;  %s257_s8 = sand.u32 1, %s976_s16  }
  0x1c   : > { %s715_s24 = sshll.u32 %s266_s10, 3  ;;  %818 = vmatpush3.bf16.msra.mxu0 %v815_v8  ;;  %830 = vmatpush3.bf16.msra.mxu1 %v815_v8  ;;  %s712_s11 = sshll.u32 %s257_s8, 7 }
  0x1d   : > { %s1135_s5 = scalar_lea.vmem %s1302_s0, %s715_s24  ;;  %820 = vmatprep.subr.bf16.mxu0 %v819_v13  ;;  %826 = vmatprep.subr.bf16.mxu1 %v819_v13  ;;  %s1194_s24 = scalar_lea.vmem [#allocation2], %s712_s11 }
  0x1e   : > { %v281_v11 = vld [vmem:[%s1135_s5] sm:$0xff]  ;;  %v282_v15 = vld [vmem:[%s1135_s5 + $0x8] sm:$0xff]  ;;  %v283_v17 = vld [vmem:[%s1135_s5 + $0x10] sm:$0xff]  ;;  %s737_s14 = sshll.u32 %s1207_s19, 7  ;;  %s579_s27 = sshll.u32 %s1194_s24, 4  ;;  %s1240_s27 = int_to_ptr.vmem [resolvable:$true] %s579_s27 }
  0x1f   : > { %v289_v12 = vld [vmem:[%s1135_s5 + $0x40] sm:$0xff]  ;;  %783 = vmatprep.mubr.msk.f32.mxu0 %vm306_vm0, %v281_v11  ;;  %v290_v16 = vld [vmem:[%s1135_s5 + $0x48] sm:$0xff]  ;;  %v291_v18 = vld [vmem:[%s1135_s5 + $0x50] sm:$0xff]  ;;  %s1232_s6 = scalar_lea.hbm %s1306_s4, %s737_s14  ;;  %s1250_s18 = scalar_lea.sflag [#allocation3], %s257_s8 }
  0x20   : > { %795 = vmatprep.mubr.msk.f32.mxu1 %vm306_vm0, %v289_v12  ;;  %822 = vmatpush3.bf16.msra.mxu0 %v819_v13  ;;  %v284_v19 = vld [vmem:[%s1135_s5 + $0x18] sm:$0xff]  ;;  %v285_v21 = vld [vmem:[%s1135_s5 + $0x20] sm:$0xff]  ;;  %v286_v23 = vld [vmem:[%s1135_s5 + $0x28] sm:$0xff]  ;;  %s906_s9 = scalar_lea.vmem %s1240_s27, 2048  ;;  %s1002_s10 = smov [#allocation2]  }
  0x21   : > { %831 = vmatpush3.bf16.msra.mxu1 %v819_v13  ;;  %781 = vmatprep.subr.mxu0 %v305_v14  ;;  %v292_v20 = vld [vmem:[%s1135_s5 + $0x58] sm:$0xff]  ;;  %v293_v22 = vld [vmem:[%s1135_s5 + $0x60] sm:$0xff]  ;;  %v294_v24 = vld [vmem:[%s1135_s5 + $0x68] sm:$0xff]  ;;  %p907_p0 = scmp.ne.s32.totalorder %s1240_s27, %s906_s9  ;;  %s910_s11 = sshll.u32 %s1002_s10, 4  ;;  %s911_s11 = int_to_ptr.vmem [resolvable:$false] %s910_s11 }
  0x22   : > { %827 = vmatprep.subr.mxu1 %v305_v14  ;;  %v287_v25 = vld [vmem:[%s1135_s5 + $0x30] sm:$0xff]  ;;  %v288_v27 = vld [vmem:[%s1135_s5 + $0x38] sm:$0xff]  ;;  %s912_s12 = scalar_lea.vmem %s911_s11, 4096  ;;  %p913_p4 = scmp.lt.s32.totalorder %s1240_s27, %s911_s11 }
  0x23   : > { %v295_v26 = vld [vmem:[%s1135_s5 + $0x70] sm:$0xff]  ;;  %v296_v28 = vld [vmem:[%s1135_s5 + $0x78] sm:$0xff]  ;;  %p908_p1 = pnand %p907_p0, %p1081_p3  ;;  %p914_p5 = scmp.lt.s32.totalorder %s912_s12, %s906_s9 }
  0x24   : > { %782 = vmatpush3.msra.mxu0 %v305_v14 }
  0x25   : > { %832 = vmatpush3.msra.mxu1 %v305_v14  ;;  %784 = vmatmul.mubr.msk.f32.vlgmr.msra.gmra.mrb[0].mxu0 %vm306_vm0, %v282_v15  ;;  %p909_p2 = pneg %p908_p1  ;;  %p915_p6 = por %p914_p5, %p913_p4 }
  0x26   : > { %796 = vmatmul.mubr.msk.f32.vlgmr.msra.gmra.mrb[0].mxu1 %vm306_vm0, %v290_v16  ;;  %786 = vmatprep.mubr.msk.f32.mxu0 %vm306_vm0, %v283_v17 }
  0x27   : > { %798 = vmatprep.mubr.msk.f32.mxu1 %vm306_vm0, %v291_v18  ;;  %p916_p7 = pnand %p915_p6, %p909_p2 }
  0x29   : > { %787 = vmatmul.mubr.msk.f32.gmra.mrb[2].mxu0 %vm306_vm0, %v284_v19 }
  0x2a   : > { %799 = vmatmul.mubr.msk.f32.gmra.mrb[2].mxu1 %vm306_vm0, %v292_v20  ;;  %789 = vmatprep.mubr.msk.f32.mxu0 %vm306_vm0, %v285_v21 }
  0x2b   : > { %801 = vmatprep.mubr.msk.f32.mxu1 %vm306_vm0, %v293_v22 }
  0x2d   : > { %790 = vmatmul.mubr.msk.f32.gmra.mrb[4].mxu0 %vm306_vm0, %v286_v23 }
  0x2e   : > { %802 = vmatmul.mubr.msk.f32.gmra.mrb[4].mxu1 %vm306_vm0, %v294_v24  ;;  %792 = vmatprep.mubr.msk.f32.mxu0 %vm306_vm0, %v287_v25 }
  0x2f   : > { %804 = vmatprep.mubr.msk.f32.mxu1 %vm306_vm0, %v295_v26 }
  0x31   : > { %793 = vmatmul.mubr.msk.f32.gmra.mrb[6].mxu0 %vm306_vm0, %v288_v27 }
  0x32   : > { %805 = vmatmul.mubr.msk.f32.gmra.mrb[6].mxu1 %vm306_vm0, %v296_v28 }
  0xf8   : > { %v785_v30 = vpop.f32.mrb[0].mxu0 }
  0xf9   : > { %v797_v32 = vpop.f32.mrb[0].mxu1  ;;  %v508_v33 = vmul.f32 %v785_v30, %v1176_v29  ;;  %v421_v35 = vpop.f32.mrb[1].mxu0 }
  0xfa   : > { %v516_v34 = vmul.f32 %v797_v32, %v1176_v29  ;;  %v461_v36 = vpop.f32.mrb[1].mxu1  ;;  %v507_v37 = vmul.f32 %v1176_v29, %v421_v35 }
  0xfb   : > { %v515_v38 = vmul.f32 %v1176_v29, %v461_v36  ;;  %v531_v39 = vadd.f32 %v1183_v31, %v508_v33 }
  0xfc   : > { %v539_v40 = vadd.f32 %v1183_v31, %v516_v34  ;;  %v530_v41 = vadd.f32 %v1183_v31, %v507_v37  ;;  %v788_v43 = vpop.f32.mrb[2].mxu0 }
  0xfd   : > { %v538_v42 = vadd.f32 %v1183_v31, %v515_v38  ;;  %v800_v44 = vpop.f32.mrb[2].mxu1  ;;  %547 = vst [vmem:[%s1194_s24 + $0x8] sm:$0xff] %v531_v39  ;;  %v510_v45 = vmul.f32 %v788_v43, %v1176_v29  ;;  %v431_v47 = vpop.f32.mrb[3].mxu0 }
  0xfe   : > { %555 = vst [vmem:[%s1194_s24 + $0x48] sm:$0xff] %v539_v40  ;;  %v518_v46 = vmul.f32 %v800_v44, %v1176_v29  ;;  %v471_v48 = vpop.f32.mrb[3].mxu1  ;;  %546 = vst [vmem:[%s1194_s24] sm:$0xff] %v530_v41  ;;  %v509_v49 = vmul.f32 %v1176_v29, %v431_v47 }
  0xff   : > { %554 = vst [vmem:[%s1194_s24 + $0x40] sm:$0xff] %v538_v42  ;;  %v517_v50 = vmul.f32 %v1176_v29, %v471_v48  ;;  %v533_v51 = vadd.f32 %v1183_v31, %v510_v45 }
 0x100   : > { %v541_v52 = vadd.f32 %v1183_v31, %v518_v46  ;;  %v532_v53 = vadd.f32 %v1183_v31, %v509_v49  ;;  %v791_v55 = vpop.f32.mrb[4].mxu0 }
 0x101   : > { %v540_v54 = vadd.f32 %v1183_v31, %v517_v50  ;;  %v803_v56 = vpop.f32.mrb[4].mxu1  ;;  %549 = vst [vmem:[%s1194_s24 + $0x18] sm:$0xff] %v533_v51  ;;  %v512_v57 = vmul.f32 %v791_v55, %v1176_v29  ;;  %v441_v59 = vpop.f32.mrb[5].mxu0 }
 0x102   : > { %557 = vst [vmem:[%s1194_s24 + $0x58] sm:$0xff] %v541_v52  ;;  %v520_v58 = vmul.f32 %v803_v56, %v1176_v29  ;;  %v481_v60 = vpop.f32.mrb[5].mxu1  ;;  %548 = vst [vmem:[%s1194_s24 + $0x10] sm:$0xff] %v532_v53  ;;  %v511_v61 = vmul.f32 %v1176_v29, %v441_v59 }
 0x103   : > { %556 = vst [vmem:[%s1194_s24 + $0x50] sm:$0xff] %v540_v54  ;;  %v519_v62 = vmul.f32 %v1176_v29, %v481_v60  ;;  %v535_v63 = vadd.f32 %v1183_v31, %v512_v57 }
 0x104   : > { %v543_v0 = vadd.f32 %v1183_v31, %v520_v58  ;;  %v534_v1 = vadd.f32 %v1183_v31, %v511_v61  ;;  %v794_v3 = vpop.f32.mrb[6].mxu0 }
 0x105   : > { %v542_v2 = vadd.f32 %v1183_v31, %v519_v62  ;;  %v806_v4 = vpop.f32.mrb[6].mxu1  ;;  %551 = vst [vmem:[%s1194_s24 + $0x28] sm:$0xff] %v535_v63  ;;  %v514_v5 = vmul.f32 %v794_v3, %v1176_v29  ;;  %v451_v7 = vpop.f32.mrb[7].mxu0 }
 0x106   : > { %559 = vst [vmem:[%s1194_s24 + $0x68] sm:$0xff] %v543_v0  ;;  %v522_v6 = vmul.f32 %v806_v4, %v1176_v29  ;;  %v491_v8 = vpop.f32.mrb[7].mxu1  ;;  %550 = vst [vmem:[%s1194_s24 + $0x20] sm:$0xff] %v534_v1  ;;  %v513_v9 = vmul.f32 %v1176_v29, %v451_v7 }
 0x107   : > { %558 = vst [vmem:[%s1194_s24 + $0x60] sm:$0xff] %v542_v2  ;;  %v521_v10 = vmul.f32 %v1176_v29, %v491_v8  ;;  %v537_v11 = vadd.f32 %v1183_v31, %v514_v5 }
 0x108   : > { %v545_v12 = vadd.f32 %v1183_v31, %v522_v6  ;;  %v536_v13 = vadd.f32 %v1183_v31, %v513_v9 }
 0x109   : > { %v544_v14 = vadd.f32 %v1183_v31, %v521_v10  ;;  %553 = vst [vmem:[%s1194_s24 + $0x38] sm:$0xff] %v537_v11 }
 0x10a   : > { %561 = vst [vmem:[%s1194_s24 + $0x78] sm:$0xff] %v545_v12  ;;  %552 = vst [vmem:[%s1194_s24 + $0x30] sm:$0xff] %v536_v13 }
 0x10b   : > { %560 = vst [vmem:[%s1194_s24 + $0x70] sm:$0xff] %v544_v14 }
 0x10c   : > { %919 = shalt.err (!%p916_p7)
}
 0x10d   : > { %s920_s8 = scalar_lea.hbm %s1232_s6, 2048  ;;  %s924_s24 = scalar_lea.hbm %s1306_s4, 8192 }
 0x10e   : > { %p921_p9 = scmp.ne.s32.totalorder %s1232_s6, %s920_s8  ;;  %p925_p12 = scmp.lt.u32.totalorder %s1232_s6, %s1306_s4 }
 0x10f   : > { %p926_p13 = scmp.lt.u32.totalorder %s924_s24, %s920_s8  ;;  %p928_p1 = scmp.lt.u32.totalorder %s920_s8, %s1232_s6 }
 0x110   : > { %p922_p10 = pnand %p921_p9, %p1081_p3 }
 0x111   : > { %p927_p0 = por %p926_p13, %p925_p12 }
 0x112   : > { %p923_p11 = pneg %p922_p10 }
 0x113   : > { %p929_p2 = por %p928_p1, %p927_p0 }
 0x115   : > { %p930_p4 = pnand %p929_p2, %p923_p11 }
 0x117   : > { %933 = shalt.err (!%p930_p4)
}
 0x118   : > { %s1003_s30 = smov 128   ;;  %s1004_s5 = smov 8  }
 0x119   : > { %833 = dma.vmem_to_hbm [thread:$0]  (%p1081_p3), %s1240_s27, 2048, %s1232_s6, %s1250_s18, %s1003_s30, %s1003_s30, %s1004_s5  }
 0x11a PF: > { %p839_p5 = scmp.ge.s32.totalorder %s1000_s22, 2  ;;  %s594_s9 = sand.u32 1, %s972_s15  }
 0x11b   : > { %s595_s10 = scalar_lea.sflag [#allocation3], %s594_s9 }
 0x11c   : > { %p836_p6 = pnand %p839_p5, %p1090_p8 }
 0x11e   : > { %967 = dma.done.wait (!%p836_p6), %s595_s10, 2048  }
 0x11f   : > { %969 = vsyncadd (!%p836_p6), %s595_s10, 4294965248  ;;  %s17_s22 = sadd.s32 1, %s1000_s22   ;;  %s1309_s15 = smov %s976_s16 }
 0x120   : > { %p14_p7 = scmp.ge.s32.totalorder %s17_s22, 6   ;;  %s1310_s16 = smov %s980_s17 }
 0x121   : > { %s1311_s17 = smov %s1099_s7  ;;  %s1312_s18 = smov %s992_s20 }
 0x122   : > { %s1313_s19 = smov %s996_s21  ;;  %s1314_s20 = smov %s1317_s25 }
 0x123   : > { %s1315_s21 = smov %s1321_s26  ;;  %16 = sbr.rel (!%p14_p7) target bundleno = 5 (0x5), region = 80 }
 0x12a   :  { %600 = vsyncpa [#allocation3], 1 }
 0x12b   :  { %602 = vsyncpa [#allocation3 + $0x1], 1 }

</bundles_post_ra>
